<compile_context>
chip_gen: v5e
topology: v5e:2x2
jax: 0.10.0
libtpu: 0.0.40
codegen_flags: <defaults>
</compile_context>

<pallas_src>
import functools

import jax
import jax.numpy as jnp
from jax.experimental import pallas as pl
from jax.experimental.pallas import tpu as pltpu


def _se_kernel(x_ref, w1_ref, w2_ref, o_ref, *, inv_hw):
    # x_ref/o_ref: (TB, C, HW)   w1_ref: (C, Cr)   w2_ref: (Cr, C)
    # Squeeze: spatial mean with f32 accumulation (sum * 1/HW).
    y = jnp.sum(x_ref[...], axis=-1, dtype=jnp.float32) * inv_hw        # (TB, C)

    # Excite: FC1 -> ReLU -> FC2 -> hard-sigmoid.  Operands in the weight
    # dtype (bf16 stays bf16 for native MXU), f32 accumulation via
    # preferred_element_type.
    wdt = w1_ref.dtype
    h = jnp.maximum(
        jnp.dot(y.astype(wdt), w1_ref[...], preferred_element_type=jnp.float32),
        0.0)
    s = jnp.dot(h.astype(wdt), w2_ref[...], preferred_element_type=jnp.float32)
    gate = jnp.clip(s + 3.0, 0.0, 6.0) * (1.0 / 6.0)                     # (TB, C)

    # Rescale: re-read x from VMEM (loads are cheap; avoids keeping a
    # multi-MiB value live across both passes) and scale in native dtype.
    o_ref[...] = (x_ref[...] * gate.astype(o_ref.dtype)[:, :, None]).astype(
        o_ref.dtype)


def _largest_divisor_le(n, cap):
    cap = max(1, min(n, cap))
    for d in range(cap, 0, -1):
        if n % d == 0:
            return d
    return 1


def se_module(x, w1, w2, *, donate_x=False):
    """SEModule forward.

    x:  (B, C, H, W) NCHW activations.
    w1: torch fc1 weight, shape (C//r, C)  (nn.Linear(C, C//r, bias=False)).
    w2: torch fc2 weight, shape (C, C//r)  (nn.Linear(C//r, C, bias=False)).
    donate_x: alias x's buffer with the output (only if the caller no longer
      needs x; shapes/dtypes match exactly since there is no padding).
    """
    b, c, h, w = x.shape
    hw = h * w
    itemsize = jnp.dtype(x.dtype).itemsize

    # PyTorch nn.Linear computes y @ W^T; pre-transpose so the kernel does y @ W.
    # Keep weights in a native-MXU dtype: bf16 if activations are bf16,
    # otherwise leave them as provided (f32 here).
    w1_t = jnp.transpose(w1)   # (C, Cr)
    w2_t = jnp.transpose(w2)   # (Cr, C)
    if x.dtype == jnp.bfloat16:
        w1_t = w1_t.astype(jnp.bfloat16)
        w2_t = w2_t.astype(jnp.bfloat16)
    cr = w1_t.shape[1]
    weight_bytes = (w1_t.size * jnp.dtype(w1_t.dtype).itemsize
                    + w2_t.size * jnp.dtype(w2_t.dtype).itemsize)

    # No HW padding: block last dim equals the full HW (allowed by the (8,128)
    # rule), so a 7x7 stage moves 49 lanes, not 128.
    x_flat = x.reshape(b, c, hw)

    # Generation-aware VMEM budget.
    try:
        vmem_cap = int(pltpu.get_tpu_info().vmem_capacity_bytes)
    except Exception:
        vmem_cap = 64 << 20   # conservative (v7x per-TC)
    block_cap_bytes = vmem_cap // 8   # ~16 MiB on v5e/v6e, ~8 MiB on v7x

    # Batch tile: (a) block fits the byte cap, (b) at least 2 grid steps
    # (>= 4 when B allows) for pipelining + v7x 2-TC sharding, (c) divides B
    # so no batch padding is needed.
    per_sample_bytes = max(1, c * hw * itemsize)
    tb_bytes = max(1, block_cap_bytes // per_sample_bytes)
    tb_steps = max(1, b // min(b, 4)) if b >= 2 else b
    tb = _largest_divisor_le(b, min(tb_bytes, tb_steps))
    grid = (b // tb,)

    block_bytes = tb * per_sample_bytes
    needed = 4 * block_bytes + 4 * weight_bytes + (4 << 20)
    vmem_limit = int(min(max(needed, 32 << 20), int(0.9 * vmem_cap)))

    cost = pl.CostEstimate(
        flops=4 * b * c * cr + 2 * b * c * hw,
        transcendentals=0,
        bytes_accessed=2 * b * c * hw * itemsize + weight_bytes,
    )

    kernel = functools.partial(_se_kernel, inv_hw=1.0 / float(hw))

    out_flat = pl.pallas_call(
        kernel,
        out_shape=jax.ShapeDtypeStruct((b, c, hw), x.dtype),
        grid=grid,
        in_specs=[
            pl.BlockSpec((tb, c, hw), lambda i: (i, 0, 0)),
            pl.BlockSpec((c, cr), lambda i: (0, 0)),   # weights stay resident
            pl.BlockSpec((cr, c), lambda i: (0, 0)),
        ],
        out_specs=pl.BlockSpec((tb, c, hw), lambda i: (i, 0, 0)),
        compiler_params=pltpu.CompilerParams(
            # "parallel" lets the runtime shard the batch grid across
            # TensorCores on multi-TC parts; each step is independent.
            dimension_semantics=("parallel",),
            vmem_limit_bytes=vmem_limit,
        ),
        cost_estimate=cost,
        input_output_aliases=({0: 0} if donate_x else {}),
    )(x_flat, w1_t, w2_t)

    return out_flat.reshape(b, c, h, w)


def se_module_ref(x, w1, w2):
    """Pure-JAX reference matching the PyTorch forward."""
    y = jnp.mean(x, axis=(2, 3))                       # (B, C)
    y = jnp.maximum(y @ w1.T, 0.0)                     # (B, C//r)
    y = y @ w2.T                                       # (B, C)
    y = jnp.clip(y + 3.0, 0.0, 6.0) / 6.0              # hsigmoid
    return x * y[:, :, None, None]


if __name__ == "__main__":
    key = jax.random.PRNGKey(0)

    # Main test: lane-aligned spatial (16*16 = 256).
    B, C, H, W = 2, 8, 16, 16
    reduction = 4
    Cr = C // reduction

    kx, k1, k2 = jax.random.split(key, 3)
    x = jax.random.normal(kx, (B, C, H, W), dtype=jnp.float32)
    w1 = jax.random.normal(k1, (Cr, C), dtype=jnp.float32) * (1.0 / (C ** 0.5))
    w2 = jax.random.normal(k2, (C, Cr), dtype=jnp.float32) * (1.0 / (Cr ** 0.5))

    out = jax.block_until_ready(se_module(x, w1, w2))
    ref = se_module_ref(x, w1, w2)
    assert out.shape == (B, C, H, W)
    assert jnp.allclose(out, ref, atol=1e-5, rtol=1e-5)

    # Second test: MobileNetV3-style 7x7 spatial (HW=49, not a multiple of
    # 128) exercises the unpadded / masked-store path.
    B2, C2, H2, W2 = 2, 16, 7, 7
    Cr2 = C2 // reduction
    kx2, k12, k22 = jax.random.split(jax.random.PRNGKey(0), 3)
    x2 = jax.random.normal(kx2, (B2, C2, H2, W2), dtype=jnp.float32)
    w12 = jax.random.normal(k12, (Cr2, C2), dtype=jnp.float32) * (1.0 / (C2 ** 0.5))
    w22 = jax.random.normal(k22, (C2, Cr2), dtype=jnp.float32) * (1.0 / (Cr2 ** 0.5))

    out2 = jax.block_until_ready(se_module(x2, w12, w22))
    ref2 = se_module_ref(x2, w12, w22)
    assert out2.shape == (B2, C2, H2, W2)
    assert jnp.allclose(out2, ref2, atol=1e-5, rtol=1e-5)

    print("KERNEL_OK")
</pallas_src>

<mosaic_0001>
module attributes {stable_mosaic.version = 11 : i64} {
  func.func @_se_kernel(%arg0: i32, %arg1: memref<1x8x256xf32, #tpu.memory_space<vmem>>, %arg2: memref<8x2xf32, #tpu.memory_space<vmem>>, %arg3: memref<2x8xf32, #tpu.memory_space<vmem>>, %arg4: memref<1x8x256xf32, #tpu.memory_space<vmem>>) attributes {dimension_semantics = [#tpu.dimension_semantics<parallel>], iteration_bounds = array<i64: 2>, scalar_prefetch = 0 : i64, scratch_operands = 0 : i64, tpu.core_type = #tpu.core_type<tc>, window_params = [{transform_indices = @transform_0, window_bounds = array<i64: 1, 8, 256>}, {pipeline_mode = #tpu.pipeline_mode<synchronous>, transform_indices = @transform_1, window_bounds = array<i64: 8, 2>}, {pipeline_mode = #tpu.pipeline_mode<synchronous>, transform_indices = @transform_2, window_bounds = array<i64: 2, 8>}, {transform_indices = @transform_3, window_bounds = array<i64: 1, 8, 256>}]} {
    %c0 = arith.constant 0 : index
    %c0_0 = arith.constant 0 : index
    %c0_1 = arith.constant 0 : index
    %0 = vector.load %arg1[%c0, %c0_0, %c0_1] : memref<1x8x256xf32, #tpu.memory_space<vmem>>, vector<1x8x256xf32>
    %cst = arith.constant dense<0.000000e+00> : vector<1x8xf32>
    %1 = vector.multi_reduction <add>, %0, %cst [2] : vector<1x8x256xf32> to vector<1x8xf32>
    %cst_2 = arith.constant 3.906250e-03 : f32
    %2 = vector.broadcast %cst_2 : f32 to vector<1x8xf32>
    %3 = arith.mulf %1, %2 : vector<1x8xf32>
    %c0_3 = arith.constant 0 : index
    %c0_4 = arith.constant 0 : index
    %4 = vector.load %arg2[%c0_3, %c0_4] : memref<8x2xf32, #tpu.memory_space<vmem>>, vector<8x2xf32>
    %cst_5 = arith.constant dense<0.000000e+00> : vector<1x2xf32>
    %5 = tpu.matmul %3, %4, %cst_5 {dimension_numbers = #tpu.dot_dimension_numbers<[1], [0], [0], [1], [0, 0, 1, 1], [], []>} : vector<1x8xf32>, vector<8x2xf32>, vector<1x2xf32> -> vector<1x2xf32>
    %cst_6 = arith.constant 0.000000e+00 : f32
    %6 = vector.broadcast %cst_6 : f32 to vector<1x2xf32>
    %7 = arith.maximumf %5, %6 : vector<1x2xf32>
    %c0_7 = arith.constant 0 : index
    %c0_8 = arith.constant 0 : index
    %8 = vector.load %arg3[%c0_7, %c0_8] : memref<2x8xf32, #tpu.memory_space<vmem>>, vector<2x8xf32>
    %cst_9 = arith.constant dense<0.000000e+00> : vector<1x8xf32>
    %9 = tpu.matmul %7, %8, %cst_9 {dimension_numbers = #tpu.dot_dimension_numbers<[1], [0], [0], [1], [0, 0, 1, 1], [], []>} : vector<1x2xf32>, vector<2x8xf32>, vector<1x8xf32> -> vector<1x8xf32>
    %cst_10 = arith.constant 3.000000e+00 : f32
    %10 = vector.broadcast %cst_10 : f32 to vector<1x8xf32>
    %11 = arith.addf %9, %10 : vector<1x8xf32>
    %cst_11 = arith.constant 0.000000e+00 : f32
    %cst_12 = arith.constant 6.000000e+00 : f32
    %12 = vector.broadcast %cst_11 : f32 to vector<1x8xf32>
    %13 = arith.maximumf %12, %11 : vector<1x8xf32>
    %14 = vector.broadcast %cst_12 : f32 to vector<1x8xf32>
    %15 = arith.minimumf %14, %13 : vector<1x8xf32>
    %cst_13 = arith.constant 0.166666672 : f32
    %16 = vector.broadcast %cst_13 : f32 to vector<1x8xf32>
    %17 = arith.mulf %15, %16 : vector<1x8xf32>
    %c0_14 = arith.constant 0 : index
    %c0_15 = arith.constant 0 : index
    %c0_16 = arith.constant 0 : index
    %18 = vector.load %arg1[%c0_14, %c0_15, %c0_16] : memref<1x8x256xf32, #tpu.memory_space<vmem>>, vector<1x8x256xf32>
    %19 = vector.shape_cast %17 : vector<1x8xf32> to vector<1x8x1xf32>
    %20 = vector.broadcast %19 : vector<1x8x1xf32> to vector<1x8x256xf32>
    %21 = arith.mulf %18, %20 : vector<1x8x256xf32>
    %c0_17 = arith.constant 0 : index
    %c0_18 = arith.constant 0 : index
    %c0_19 = arith.constant 0 : index
    %22 = vector.load %arg4[%c0_17, %c0_18, %c0_19] : memref<1x8x256xf32, #tpu.memory_space<vmem>>, vector<1x8x256xf32>
    tpu.vector_store %arg4[%c0_17, %c0_18, %c0_19], %21 {strides = array<i32>} : memref<1x8x256xf32, #tpu.memory_space<vmem>>, vector<1x8x256xf32>,
    return
  }
  func.func @transform_0(%arg0: i32) -> (i32, i32, i32) {
    %c0_i32 = arith.constant 0 : i32
    %c0_i32_0 = arith.constant 0 : i32
    %c0_i32_1 = arith.constant 0 : i32
    return %arg0, %c0_i32, %c0_i32_0 : i32, i32, i32
  }
  func.func @transform_1(%arg0: i32) -> (i32, i32) {
    %c0_i32 = arith.constant 0 : i32
    %c0_i32_0 = arith.constant 0 : i32
    %c0_i32_1 = arith.constant 0 : i32
    return %c0_i32, %c0_i32_0 : i32, i32
  }
  func.func @transform_2(%arg0: i32) -> (i32, i32) {
    %c0_i32 = arith.constant 0 : i32
    %c0_i32_0 = arith.constant 0 : i32
    %c0_i32_1 = arith.constant 0 : i32
    return %c0_i32, %c0_i32_0 : i32, i32
  }
  func.func @transform_3(%arg0: i32) -> (i32, i32, i32) {
    %c0_i32 = arith.constant 0 : i32
    %c0_i32_0 = arith.constant 0 : i32
    %c0_i32_1 = arith.constant 0 : i32
    return %arg0, %c0_i32, %c0_i32_0 : i32, i32, i32
  }
}

</mosaic_0001>

<bundles_post_ra>
// kernel: tpu_custom_call.1
= control target key start
LH: loop header
LB: loop body
LE: loop exit
PB: predicated region body
PF: predicated region fallthrough
CT: control target
= control target key end

     0   :  { %8 = vsyncpa [#allocation3], 0  ;;  %s675_s0 = inlined_call_operand.hbm [shape: f32[2,8,256], index: 0, kind: input, shape index: {}]   ;;  %s676_s1 = inlined_call_operand.vmem [shape: f32[8,2], index: 1, kind: input, shape index: {}]   ;;  %s677_s2 = inlined_call_operand.vmem [shape: f32[2,8], index: 2, kind: input, shape index: {}]   ;;  %s678_s3 = inlined_call_operand.hbm [shape: f32[2,8,256], index: 3, kind: output, shape index: {}]  }
   0x1   :  { %10 = vsyncpa [#allocation3 + $0x1], 0 }
   0x2   :  { %11 = vsyncpa [#allocation4], 0 }
   0x3   :  { %13 = vsyncpa [#allocation4 + $0x1], 0  ;;  %s538_s12 = smov 0   ;;  %s540_s13 = smov 0  }
   0x4   :  { %s542_s14 = smov 0   ;;  %s544_s15 = smov 0  }
   0x5 LB: > { %s559_s16 = sadd.s32 4294967295, %s516_s15   ;;  %s354_s17 = sadd.s32 4294967294, %s516_s15   ;;  %s516_s15 = sphi %s544_s15, %s688_s15   ;;  %s512_s14 = sphi %s542_s14, %s687_s14   ;;  %s508_s13 = sphi %s540_s13, %s686_s13   ;;  %s504_s12 = sphi %s538_s12, %s685_s12  }
   0x6   : > { %s563_s18 = sadd.s32 1, %s516_s15   ;;  %s26_s19 = sadd.s32 1, %s512_s14 }
   0x7   : > { %s23_s20 = ssub.s32 %s516_s15, %s563_s18  ;;  %p33_p0 = scmp.ne.s32.totalorder %s512_s14, %s508_s13 }
   0x8   : > { %p24_p1 = scmp.eq.s32.totalorder %s23_s20, 0  ;;  %p34_p2 = scmp.eq.s32.totalorder %s516_s15, 0 }
   0x9   : > { %p39_p3 = scmp.ne.s32.totalorder %s508_s13, %s504_s12  ;;  %p40_p4 = scmp.eq.s32.totalorder %s559_s16, 0 }
   0xa   : > { %s575_s21 = scalar_select %p24_p1, %s512_s14, %s26_s19  }
   0xb   : > { %p577_p5 = por %p34_p2, %p33_p0  ;;  %p581_p6 = por %p40_p4, %p39_p3 }
   0xc   : > { %p105_p7 = scmp.eq.s32.totalorder %s559_s16, 1  ;;  %p111_p8 = scmp.eq.s32.totalorder %s354_s17, 1 }
   0xd   : > { %p385_p10 = scmp.lt.s32.totalorder %s516_s15, 2  ;;  %s137_s26 = sand.u32 1, %s512_s14  }
   0xe   : > { %p588_p11 = por %p105_p7, %p33_p0  ;;  %p592_p12 = por %p111_p8, %p39_p3 }
   0xf   : > { %s371_s27 = sshll.u32 %s516_s15, 4  ;;  %s357_s28 = sshll.u32 %s137_s26, 4 }
  0x10   : > { %s146_s4 = scalar_lea.hbm %s675_s0, %s371_s27  ;;  %s141_s6 = scalar_lea.vmem [#allocation2], %s357_s28 }
  0x11   : > { %s148_s5 = sshll.u32 %s146_s4, 4  ;;  %s150_s7 = sshll.u32 %s141_s6, 4  ;;  %s149_s5 = int_to_ptr.hbm [resolvable:$true] %s148_s5  ;;  %s151_s7 = int_to_ptr.vmem [resolvable:$true] %s150_s7 }
  0x12   : > { %p603_p13 = pnand %p385_p10, %p577_p5  ;;  %p360_p0 = scmp.ge.s32.totalorder %s516_s15, 1 }
  0x13   : > { %p155_p1 = scmp.lt.s32.totalorder %s516_s15, 3  ;;  %s138_s9 = scalar_lea.sflag [#allocation3], %s137_s26 }
  0x14   : > { %s420_s10 = sshra.s32 %s149_s5, 4  ;;  %p424_p3 = pneg %p603_p13  ;;  %s421_s10 = int_to_ptr.hbm [resolvable:$true] %s420_s10 }
  0x15   : > { %s422_s11 = scalar_lea.hbm %s421_s10, 16  ;;  %s427_s20 = scalar_lea.hbm %s675_s0, 32 }
  0x16   : > { %p423_p2 = scmp.ne.s32.totalorder %s421_s10, %s422_s11  ;;  %p428_p5 = scmp.lt.s32.totalorder %s421_s10, %s675_s0 }
  0x17   : > { %p429_p8 = scmp.lt.s32.totalorder %s427_s20, %s422_s11 }
  0x18   : > { %p425_p4 = pnand %p424_p3, %p423_p2 }
  0x19   : > { %p430_p10 = por %p429_p8, %p428_p5 }
  0x1a   : > { %p426_p7 = pneg %p425_p4 }
  0x1c   : > { %p431_p9 = pnand %p430_p10, %p426_p7 }
  0x1e   : > { %434 = shalt.err (!%p431_p9)
}
  0x1f   : > { %380 = dma.hbm_to_vmem [thread:$0]  (!%p603_p13), %s149_s5, 256, %s151_s7, %s138_s9  }
  0x20   : > { %p156_p2 = pnand %p360_p0, %p155_p1 }
  0x21   : > { %s624_s26 = sand.u32 (!%p156_p2), 1, %s508_s13  }
  0x22   : > { %159 = sbr.rel (%p156_p2) target bundleno = 548 (0x224), region = 32  ;;  %s361_s28 = sshll.u32 (!%p156_p2), %s624_s26, 4 }
  0x23   : > { %s162_s29 = scalar_lea.sflag (!%p156_p2), [#allocation3], %s624_s26  ;;  %s165_s30 = scalar_lea.vmem (!%p156_p2), [#allocation2], %s361_s28 }
  0x27   : > { %495 = dma.done.wait (%p581_p6), %s162_s29, 256  }
  0x28   : > { %497 = vsyncadd (%p581_p6), %s162_s29, 4294967040  ;;  %v189_v0 = vld [vmem:[%s165_s30] sm:$0xff]  ;;  %v190_v1 = vld [vmem:[%s165_s30 + $0x8] sm:$0xff]  ;;  %v197_v4 = vlaneseq  ;;  %vm200_vm0 = vcmask 64512   ;;  %vm229_vm1 = vcmask 1041408   ;;  %vm225_vm2 = vcmask 15360  }
  0x29   : > { %v191_v2 = vadd.f32 %v190_v1, %v189_v0  ;;  %v195_v3 = vld [vmem:[%s676_s1] sm:$0xff]  ;;  %s372_s23 = sshll.u32 %s559_s16, 4  ;;  %s188_s11 = scalar_lea.vmem [#allocation5], %s361_s28 }
  0x2a   : > { %218 = vmatpush.msra.mxu0 %v195_v3  ;;  %v198_v5 = vand.u32 127, %v197_v4  ;;  %v224_v9 = vld [vmem:[%s677_s2] sm:$0x3]  ;;  %v258_v12 = vshrl.u32 %v197_v4, 7  ;;  %s279_s10 = scalar_lea.hbm %s678_s3, %s372_s23  ;;  %s281_s17 = sshll.u32 %s188_s11, 4  ;;  %s282_s17 = int_to_ptr.vmem [resolvable:$true] %s281_s17 }
  0x2b   : > { %192 = vadd.xlane.f32.xlu0 %v191_v2  ;;  %364 = vmatpush.msk.msra.mxu1 %vm229_vm1, %v224_v9  ;;  %s283_s19 = sshll.u32 %s279_s10, 4  ;;  %s268_s20 = scalar_lea.sflag [#allocation4], %s624_s26  ;;  %s284_s19 = int_to_ptr.hbm [resolvable:$true] %s283_s19 }
  0x2c   : > { %419 = vset.pattern.permute.xlu0 %v258_v12  ;;  %s464_s22 = sshra.s32 %s284_s19, 4  ;;  %s470_s28 = scalar_lea.hbm %s678_s3, 32  ;;  %s465_s22 = int_to_ptr.hbm [resolvable:$true] %s464_s22 }
  0x2d   : > { %s466_s16 = scalar_lea.hbm %s465_s22, 16  ;;  %p471_p0 = scmp.lt.s32.totalorder %s465_s22, %s678_s3 }
  0x2e   : > { %p467_p6 = scmp.ne.s32.totalorder %s465_s22, %s466_s16  ;;  %p472_p1 = scmp.lt.s32.totalorder %s470_s28, %s466_s16 }
  0x30   : > { %p468_p9 = pnand %p467_p6, %p588_p11  ;;  %p473_p3 = por %p472_p1, %p471_p0 }
  0x32   : > { %p469_p13 = pneg %p468_p9 }
  0x34   : > { %p474_p4 = pnand %p473_p3, %p469_p13 }
  0x9e   : > { %v193_v6 = vpop.xlane.xlu0 %192 }
  0x9f   : > { %v194_v7 = vmul.f32 0.00390625, %v193_v6 }
  0xa1   : > { %v199_v8 = vperm.slane %v194_v7, %v198_v5 }
  0xa3   : > { %363 = vmatmul.msk.f32.vlgmr.msra.gmra.mxu0 %vm200_vm0, %v199_v8 }
 0x120   : > { %v220_v10 = vpop.f32.mrf.mxu0 }
 0x121   : > { %v223_v11 = vmax.f32 %v220_v10, 0.0 }
 0x123   : > { %365 = vmatmul.msk.f32.vlgmr.msra.gmra.mxu1 %vm225_vm2, %v223_v11 }
 0x1a0   : > { %v250_v13 = vpop.f32.mrf.mxu1 }
 0x1a1   : > { %v251_v14 = vadd.f32 3.0, %v250_v13 }
 0x1a3   : > { %v253_v15 = vmax.f32 %v251_v14, 0.0 }
 0x1a5   : > { %v254_v16 = vmin.f32 %v253_v15, 6.0 }
 0x1a7   : > { %v255_v17 = vmul.f32 0.16666667, %v254_v16 }
 0x1a9   : > { %v256_v18 = vperm.slane %v255_v17, 0 }
 0x1ab   : > { %261 = vperm.xlu0 %419, %v256_v18  }
 0x21d   : > { %v262_v19 = vpop.permute.xlu0 %261 }
 0x21e   : > { %v263_v20 = vmul.f32 %v262_v19, %v189_v0  ;;  %v264_v21 = vmul.f32 %v262_v19, %v190_v1 }
 0x220   : > { %265 = vst [vmem:[%s188_s11] sm:$0xff] %v263_v20 }
 0x221   : > { %266 = vst [vmem:[%s188_s11 + $0x8] sm:$0xff] %v264_v21 }
 0x222   : > { %477 = shalt.err (!%p474_p4)
}
 0x223   : > { %375 = dma.vmem_to_hbm [thread:$0]  (%p588_p11), %s282_s17, 256, %s284_s19, %s268_s20  }
 0x224 PF: > { %s295_s26 = sand.u32 1, %s504_s12   ;;  %p684_p7 = scmp.ge.s32.totalorder %s516_s15, 2 }
 0x225   : > { %s296_s5 = scalar_lea.sflag [#allocation4], %s295_s26 }
 0x226   : > { %p382_p5 = pnand %p684_p7, %p592_p12 }
 0x228   : > { %p383_p8 = pneg %p382_p5 }
 0x22a   : > { %499 = dma.done.wait (%p383_p8), %s296_s5, 256  }
 0x22b   : > { %501 = vsyncadd (%p383_p8), %s296_s5, 4294967040  ;;  %p16_p10 = scmp.ge.s32.totalorder %s563_s18, 4   ;;  %s685_s12 = smov %s508_s13 }
 0x22c   : > { %s686_s13 = smov %s512_s14  ;;  %s687_s14 = smov %s575_s21 }
 0x22d   : > { %s688_s15 = smov %s563_s18  ;;  %18 = sbr.rel (!%p16_p10) target bundleno = 5 (0x5), region = 77 }
 0x232   :  { %302 = vsyncpa [#allocation3], 1 }
 0x233   :  { %304 = vsyncpa [#allocation3 + $0x1], 1 }
 0x234   :  { %305 = vsyncpa [#allocation4], 1 }
 0x235   :  { %307 = vsyncpa [#allocation4 + $0x1], 1 }

</bundles_post_ra>
